<compile_context>
chip_gen: v7x
topology: tpu7x:2x2x1
jax: 0.10.0
libtpu: 0.0.40
codegen_flags: <defaults>
</compile_context>

<pallas_src>
import jax
import jax.numpy as jnp
from jax.experimental import pallas as pl
from jax.experimental.pallas import tpu as pltpu

_MAX_BLOCK_BYTES = 2 * 1024 * 1024      # per streamed buffer (v7x 64 MiB VMEM safe)
_VMEM_LIMIT_BYTES = 32 * 1024 * 1024    # explicit scoped-VMEM budget (ok on all gens)


def _dc_combine_kernel(lam_ref, mask_ref, k0_ref, ksp_ref, refine_ref, out_ref):
    """out = kspace + (-lam * mask * (kspace - k0)) - refinement  (elementwise).

    lam is a real scalar and mask is real-valued, so the complex multiply is
    an identical scaling of the interleaved real/imag lanes -> pure VPU math.
    mask_ref is a single per-coil tile (TR, LANE) broadcast in-register over
    the leading coil axis of the data block (no HBM-side broadcast).
    """
    neg_lam = -lam_ref[0]
    ksp = ksp_ref[...]
    m = mask_ref[...][None]                       # (1, TR, LANE)
    dc = neg_lam * m * (ksp - k0_ref[...])
    out_ref[...] = ksp + dc - refine_ref[...]


def _largest_divisor(n, cap, multiple_of=1):
    """Largest divisor of n that is <= cap and a multiple of `multiple_of`."""
    d = (cap // multiple_of) * multiple_of
    while d >= multiple_of:
        if n % d == 0:
            return d
        d -= multiple_of
    return None


def dc_combine(lam, k0, kspace, mask, refinement):
    """Pallas-accelerated DC combine.  k-space tensors are (C, H, W, 2)."""
    C, H, W, two = kspace.shape
    assert two == 2
    dtype = kspace.dtype
    itemsize = jnp.dtype(dtype).itemsize
    per_coil = H * W * 2

    # per-coil mask interleaved over real/imag, exactly matching the data layout
    mask_ri = jnp.broadcast_to(mask[:, :, None].astype(dtype), (H, W, 2))

    # ---- choose a lane-dense flattened layout ----
    lane = next((c for c in (1024, 512, 256, 128) if per_coil % c == 0), None)

    if lane is not None:
        rows = per_coil // lane
        # rows per block: whole coil if it fits the per-buffer cap, else the
        # largest sublane-aligned divisor that does (full dim is always legal,
        # so the rare no-divisor case just falls back to a whole coil).
        max_rows = max(1, _MAX_BLOCK_BYTES // (lane * itemsize))
        if rows <= max_rows:
            tr = rows
        else:
            tr = _largest_divisor(rows, max_rows, multiple_of=8) or rows
        # coils per block: grow tiny blocks toward the per-buffer cap
        max_cb = max(1, _MAX_BLOCK_BYTES // (tr * lane * itemsize))
        cb = _largest_divisor(C, min(C, max_cb)) or 1

        k0_f = k0.reshape(C, rows, lane)
        ksp_f = kspace.reshape(C, rows, lane)
        ref_f = refinement.reshape(C, rows, lane)
        mask_f = mask_ri.reshape(rows, lane)

        grid = (rows // tr, C // cb)              # coil axis innermost -> mask resident
        data_spec = pl.BlockSpec((cb, tr, lane), lambda r, c: (c, r, 0))
        mask_spec = pl.BlockSpec((tr, lane), lambda r, c: (r, 0))
        dims = ("parallel", "parallel")
        out_rows, out_lane = rows, lane
    else:
        # Fallback when H*W*2 is not 128-divisible: one coil per grid step with
        # full (H, 2W) tiles (always legal); mask still VMEM-resident across coils.
        out_lane = 2 * W
        out_rows = H
        k0_f = k0.reshape(C, H, out_lane)
        ksp_f = kspace.reshape(C, H, out_lane)
        ref_f = refinement.reshape(C, H, out_lane)
        mask_f = mask_ri.reshape(H, out_lane)

        grid = (C,)
        data_spec = pl.BlockSpec((1, H, out_lane), lambda c: (c, 0, 0))
        mask_spec = pl.BlockSpec((H, out_lane), lambda c: (0, 0))
        dims = ("parallel",)

    out = pl.pallas_call(
        _dc_combine_kernel,
        out_shape=jax.ShapeDtypeStruct((C, out_rows, out_lane), dtype),
        grid_spec=pltpu.PrefetchScalarGridSpec(
            num_scalar_prefetch=0,
            grid=grid,
            in_specs=[
                pl.BlockSpec(memory_space=pltpu.MemorySpace.SMEM),  # lam (1,)
                mask_spec,   # per-coil mask, VMEM-resident across the coil axis
                data_spec,   # k0
                data_spec,   # kspace
                data_spec,   # refinement
            ],
            out_specs=data_spec,
        ),
        compiler_params=pltpu.CompilerParams(
            dimension_semantics=dims,
            vmem_limit_bytes=_VMEM_LIMIT_BYTES,
        ),
    )(lam, mask_f, k0_f, ksp_f, ref_f)
    return out.reshape(C, H, W, 2)


# ----- injected encoding / decoding operators (plain-JAX glue, SENSE-style) -----
# TODO(synk): FFT has no Pallas TPU primitive; encoding/decoding stay in XLA.

def decoding_op(kspace, smaps):
    """Adjoint SENSE: sum_c conj(S_c) * IFFT2(kspace_c) -> image (H, W, 2)."""
    ksp_c = kspace[..., 0] + 1j * kspace[..., 1]
    im_coils = jnp.fft.ifftn(ksp_c, axes=(-2, -1), norm="ortho")
    image_c = jnp.sum(jnp.conj(smaps) * im_coils, axis=0)
    return jnp.stack([image_c.real, image_c.imag], axis=-1)


def encoding_op(image, smaps):
    """Forward SENSE: FFT2(S_c * image) per coil -> kspace (C, H, W, 2)."""
    image_c = image[..., 0] + 1j * image[..., 1]
    ksp_c = jnp.fft.fftn(smaps * image_c[None], axes=(-2, -1), norm="ortho")
    return jnp.stack([ksp_c.real, ksp_c.imag], axis=-1).astype(image.dtype)


# ----- EEVarNet_Block.forward -----

def eevarnet_block_forward(k0, kspace, mask, smaps, lam):
    image = decoding_op(kspace, smaps)
    # self.model is not a UNet2D instance in this synthetic setup, so the
    # `isinstance(self.model, UNet2D)` branch is skipped (exactly the PyTorch
    # control flow for a non-UNet2D model).
    # TODO(synk): UNet2D refinement network not instantiated here.
    refinement = encoding_op(image, smaps)
    return dc_combine(lam, k0, kspace, mask, refinement)


if __name__ == "__main__":
    key = jax.random.PRNGKey(0)
    C, H, W = 4, 16, 16
    k_k0, k_ksp, k_mask, k_sr, k_si = jax.random.split(key, 5)

    k0 = jax.random.normal(k_k0, (C, H, W, 2), jnp.float32)
    kspace = jax.random.normal(k_ksp, (C, H, W, 2), jnp.float32)
    mask = (jax.random.uniform(k_mask, (H, W)) > 0.5).astype(jnp.float32)

    smaps = (
        jax.random.normal(k_sr, (C, H, W)) + 1j * jax.random.normal(k_si, (C, H, W))
    ).astype(jnp.complex64)
    smaps = smaps / jnp.sqrt(jnp.sum(jnp.abs(smaps) ** 2, axis=0, keepdims=True) + 1e-6)

    # nn.Parameter(scale_init * torch.ones(1)), scale_init = 1.0
    lam = 1.0 * jnp.ones((1,), jnp.float32)

    out = eevarnet_block_forward(k0, kspace, mask, smaps, lam)
    out = jax.block_until_ready(out)

    # plain-JAX reference for the DC combine (same encoding/decoding glue)
    image = decoding_op(kspace, smaps)
    refinement = encoding_op(image, smaps)
    ksp_c = kspace[..., 0] + 1j * kspace[..., 1]
    k0_c = k0[..., 0] + 1j * k0[..., 1]
    dc_c = -1.0 * lam[0] * mask[None] * (ksp_c - k0_c)
    dc = jnp.stack([dc_c.real, dc_c.imag], axis=-1)
    ref_out = kspace + dc - refinement

    err = float(jnp.max(jnp.abs(out - ref_out)))
    assert err < 1e-5, f"max abs error {err}"
    print("KERNEL_OK")
</pallas_src>

<mosaic_0001>
module attributes {stable_mosaic.version = 11 : i64} {
  func.func @_dc_combine_kernel(%arg0: i32, %arg1: i32, %arg2: memref<1xf32, #tpu.memory_space<smem>>, %arg3: memref<1x512xf32, #tpu.memory_space<vmem>>, %arg4: memref<4x1x512xf32, #tpu.memory_space<vmem>>, %arg5: memref<4x1x512xf32, #tpu.memory_space<vmem>>, %arg6: memref<4x1x512xf32, #tpu.memory_space<vmem>>, %arg7: memref<4x1x512xf32, #tpu.memory_space<vmem>>) attributes {dimension_semantics = [#tpu.dimension_semantics<parallel>, #tpu.dimension_semantics<parallel>], iteration_bounds = array<i64: 1, 1>, scalar_prefetch = 0 : i64, scratch_operands = 0 : i64, tpu.core_type = #tpu.core_type<tc>, window_params = [{transform_indices = @transform_0, window_bounds = array<i64: 1>}, {transform_indices = @transform_1, window_bounds = array<i64: 1, 512>}, {transform_indices = @transform_2, window_bounds = array<i64: 4, 1, 512>}, {transform_indices = @transform_3, window_bounds = array<i64: 4, 1, 512>}, {transform_indices = @transform_4, window_bounds = array<i64: 4, 1, 512>}, {transform_indices = @transform_5, window_bounds = array<i64: 4, 1, 512>}]} {
    %c0 = arith.constant 0 : index
    %0 = memref.load %arg2[%c0] : memref<1xf32, #tpu.memory_space<smem>>
    %cst = arith.constant 0.000000e+00 : f32
    %1 = arith.subf %cst, %0 : f32
    %c0_0 = arith.constant 0 : index
    %c0_1 = arith.constant 0 : index
    %c0_2 = arith.constant 0 : index
    %2 = vector.load %arg5[%c0_0, %c0_1, %c0_2] : memref<4x1x512xf32, #tpu.memory_space<vmem>>, vector<4x1x512xf32>
    %c0_3 = arith.constant 0 : index
    %c0_4 = arith.constant 0 : index
    %3 = vector.load %arg3[%c0_3, %c0_4] : memref<1x512xf32, #tpu.memory_space<vmem>>, vector<1x512xf32>
    %4 = vector.shape_cast %3 : vector<1x512xf32> to vector<1x1x512xf32>
    %5 = vector.broadcast %1 : f32 to vector<1x1x512xf32>
    %6 = arith.mulf %5, %4 : vector<1x1x512xf32>
    %c0_5 = arith.constant 0 : index
    %c0_6 = arith.constant 0 : index
    %c0_7 = arith.constant 0 : index
    %7 = vector.load %arg4[%c0_5, %c0_6, %c0_7] : memref<4x1x512xf32, #tpu.memory_space<vmem>>, vector<4x1x512xf32>
    %8 = arith.subf %2, %7 : vector<4x1x512xf32>
    %9 = vector.broadcast %6 : vector<1x1x512xf32> to vector<4x1x512xf32>
    %10 = arith.mulf %9, %8 : vector<4x1x512xf32>
    %11 = arith.addf %2, %10 : vector<4x1x512xf32>
    %c0_8 = arith.constant 0 : index
    %c0_9 = arith.constant 0 : index
    %c0_10 = arith.constant 0 : index
    %12 = vector.load %arg6[%c0_8, %c0_9, %c0_10] : memref<4x1x512xf32, #tpu.memory_space<vmem>>, vector<4x1x512xf32>
    %13 = arith.subf %11, %12 : vector<4x1x512xf32>
    %c0_11 = arith.constant 0 : index
    %c0_12 = arith.constant 0 : index
    %c0_13 = arith.constant 0 : index
    %14 = vector.load %arg7[%c0_11, %c0_12, %c0_13] : memref<4x1x512xf32, #tpu.memory_space<vmem>>, vector<4x1x512xf32>
    tpu.vector_store %arg7[%c0_11, %c0_12, %c0_13], %13 {strides = array<i32>} : memref<4x1x512xf32, #tpu.memory_space<vmem>>, vector<4x1x512xf32>,
    return
  }
  func.func @transform_0(%arg0: i32, %arg1: i32) -> i32 {
    %c0_i32 = arith.constant 0 : i32
    %c0_i32_0 = arith.constant 0 : i32
    return %c0_i32 : i32
  }
  func.func @transform_1(%arg0: i32, %arg1: i32) -> (i32, i32) {
    %c0_i32 = arith.constant 0 : i32
    %c0_i32_0 = arith.constant 0 : i32
    return %arg0, %c0_i32 : i32, i32
  }
  func.func @transform_2(%arg0: i32, %arg1: i32) -> (i32, i32, i32) {
    %c0_i32 = arith.constant 0 : i32
    %c0_i32_0 = arith.constant 0 : i32
    return %arg1, %arg0, %c0_i32 : i32, i32, i32
  }
  func.func @transform_3(%arg0: i32, %arg1: i32) -> (i32, i32, i32) {
    %c0_i32 = arith.constant 0 : i32
    %c0_i32_0 = arith.constant 0 : i32
    return %arg1, %arg0, %c0_i32 : i32, i32, i32
  }
  func.func @transform_4(%arg0: i32, %arg1: i32) -> (i32, i32, i32) {
    %c0_i32 = arith.constant 0 : i32
    %c0_i32_0 = arith.constant 0 : i32
    return %arg1, %arg0, %c0_i32 : i32, i32, i32
  }
  func.func @transform_5(%arg0: i32, %arg1: i32) -> (i32, i32, i32) {
    %c0_i32 = arith.constant 0 : i32
    %c0_i32_0 = arith.constant 0 : i32
    return %arg1, %arg0, %c0_i32 : i32, i32, i32
  }
}

</mosaic_0001>

<bundles_post_ra>
// kernel: tpu_custom_call.1
= control target key start
LH: loop header
LB: loop body
LE: loop exit
PB: predicated region body
PF: predicated region fallthrough
CT: control target
= control target key end

     0   :  { %11 = vsyncpa [#allocation4], 0  ;;  %s384_s0 = inlined_call_operand.<no memory space> [shape: f32[1], index: 0, kind: input, shape index: {}]   ;;  %s385_s1 = inlined_call_operand.hbm [shape: f32[1,512], index: 1, kind: input, shape index: {}]   ;;  %s386_s2 = inlined_call_operand.hbm [shape: f32[4,1,512], index: 2, kind: input, shape index: {}]   ;;  %s387_s3 = inlined_call_operand.hbm [shape: f32[4,1,512], index: 3, kind: input, shape index: {}]   ;;  %s388_s4 = inlined_call_operand.hbm [shape: f32[4,1,512], index: 4, kind: input, shape index: {}]   ;;  %s389_s5 = inlined_call_operand.hbm [shape: f32[4,1,512], index: 5, kind: output, shape index: {}]  }
   0x1   :  { %12 = vsyncpa [#allocation7], 0 }
   0x2   :  { %13 = vsyncpa [#allocation10], 0 }
   0x3   :  { %14 = vsyncpa [#allocation5], 0  ;;  %s260_s18 = smov [#allocation6]   ;;  %s142_s22 = scalar_lea.hbm %s386_s2, 256 }
   0x4   :  { %s32_s19 = sshll.u32 %s260_s18, 4  ;;  %p143_p0 = scmp.ne.s32.totalorder %s386_s2, %s142_s22  ;;  %s33_s19 = int_to_ptr.vmem [resolvable:$true] %s32_s19 }
   0x5   :  { %p146_p1 = scmp.lt.u32.totalorder %s142_s22, %s386_s2 }
   0x7   :  { %p148_p2 = pnand %p146_p1, %p143_p0 }
   0x9   :  { %151 = shalt.err (!%p148_p2)
}
   0xa   :  { %s152_s27 = scalar_lea.vmem %s33_s19, 256  ;;  %p157_p4 = scmp.lt.s32.totalorder %s33_s19, %s33_s19 }
   0xb   :  { %p153_p3 = scmp.ne.s32.totalorder %s33_s19, %s152_s27  ;;  %p158_p5 = scmp.lt.s32.totalorder %s152_s27, %s152_s27 }
   0xd   :  { %p159_p6 = por %p158_p5, %p157_p4 }
   0xf   :  { %p160_p7 = pnand %p159_p6, %p153_p3 }
  0x11   :  { %163 = shalt.err (!%p160_p7)
}
  0x12   :  { %s261_s28 = smov 64   ;;  %s262_s29 = smov 4  }
  0x13   :  { %38 = dma.hbm_to_vmem [thread:$0]  %s386_s2, 256, %s33_s19, [#allocation7], %s261_s28, %s261_s28, %s262_s29  }
  0x14   :  { %s263_s7 = smov [#allocation3]   ;;  %s264_s9 = smov [#allocation8]  }
  0x15   :  { %s23_s8 = sshll.u32 %s263_s7, 4  ;;  %s44_s10 = sshll.u32 %s264_s9, 4  ;;  %s24_s8 = int_to_ptr.vmem [resolvable:$true] %s23_s8  ;;  %s45_s10 = int_to_ptr.vmem [resolvable:$true] %s44_s10 }
  0x16   :  { %s164_s13 = scalar_lea.hbm %s385_s1, 64 }
  0x17   :  { %p165_p8 = scmp.ne.s32.totalorder %s385_s1, %s164_s13  ;;  %p168_p9 = scmp.lt.u32.totalorder %s164_s13, %s385_s1 }
  0x19   :  { %p170_p10 = pnand %p168_p9, %p165_p8 }
  0x1b   :  { %173 = shalt.err (!%p170_p10)
}
  0x1c   :  { %s174_s2 = scalar_lea.vmem %s24_s8, 64  ;;  %p179_p12 = scmp.lt.s32.totalorder %s24_s8, %s24_s8 }
  0x1d   :  { %p175_p11 = scmp.ne.s32.totalorder %s24_s8, %s174_s2  ;;  %p180_p13 = scmp.lt.s32.totalorder %s174_s2, %s174_s2 }
  0x1f   :  { %p181_p0 = por %p180_p13, %p179_p12 }
  0x21   :  { %p182_p1 = pnand %p181_p0, %p175_p11 }
  0x23   :  { %185 = shalt.err (!%p182_p1)
}
  0x24   :  { %26 = dma.hbm_to_vmem [thread:$0]  %s385_s1, 64, %s24_s8, [#allocation4]  }
  0x25   :  { %s186_s22 = scalar_lea.hbm %s387_s3, 256 }
  0x26   :  { %p187_p2 = scmp.ne.s32.totalorder %s387_s3, %s186_s22  ;;  %p190_p3 = scmp.lt.u32.totalorder %s186_s22, %s387_s3 }
  0x28   :  { %p192_p4 = pnand %p190_p3, %p187_p2 }
  0x2a   :  { %195 = shalt.err (!%p192_p4)
}
  0x2b   :  { %s196_s27 = scalar_lea.vmem %s45_s10, 256  ;;  %p201_p6 = scmp.lt.s32.totalorder %s45_s10, %s45_s10 }
  0x2c   :  { %p197_p5 = scmp.ne.s32.totalorder %s45_s10, %s196_s27  ;;  %p202_p7 = scmp.lt.s32.totalorder %s196_s27, %s196_s27 }
  0x2e   :  { %p203_p8 = por %p202_p7, %p201_p6 }
  0x30   :  { %p204_p9 = pnand %p203_p8, %p197_p5 }
  0x32   :  { %207 = shalt.err (!%p204_p9)
}
  0x33   :  { %50 = dma.hbm_to_vmem [thread:$0]  %s387_s3, 256, %s45_s10, [#allocation7], %s261_s28, %s261_s28, %s262_s29  }
  0x34   :  { %s265_s6 = smov [#allocation9]   ;;  %s208_s11 = scalar_lea.hbm %s388_s4, 256 }
  0x35   :  { %s56_s7 = sshll.u32 %s265_s6, 4  ;;  %p209_p10 = scmp.ne.s32.totalorder %s388_s4, %s208_s11  ;;  %s57_s7 = int_to_ptr.vmem [resolvable:$true] %s56_s7 }
  0x36   :  { %p212_p11 = scmp.lt.u32.totalorder %s208_s11, %s388_s4 }
  0x38   :  { %p214_p12 = pnand %p212_p11, %p209_p10 }
  0x3a   :  { %217 = shalt.err (!%p214_p12)
}
  0x3b   :  { %s218_s16 = scalar_lea.vmem %s57_s7, 256  ;;  %p223_p0 = scmp.lt.s32.totalorder %s57_s7, %s57_s7 }
  0x3c   :  { %p219_p13 = scmp.ne.s32.totalorder %s57_s7, %s218_s16  ;;  %p224_p1 = scmp.lt.s32.totalorder %s218_s16, %s218_s16 }
  0x3e   :  { %p225_p2 = por %p224_p1, %p223_p0 }
  0x40   :  { %p226_p3 = pnand %p225_p2, %p219_p13 }
  0x42   :  { %229 = shalt.err (!%p226_p3)
}
  0x43   :  { %62 = dma.hbm_to_vmem [thread:$0]  %s388_s4, 256, %s57_s7, [#allocation10], %s261_s28, %s261_s28, %s262_s29  }
  0x44   :  { %252 = dma.done.wait [#allocation4], 64  }
  0x45   :  { %253 = vsyncadd [#allocation4], 4294967232 }
  0x46   :  { %254 = dma.done.wait [#allocation7], 512  }
  0x47   :  { %255 = vsyncadd [#allocation7], 4294966784 }
  0x48   :  { %256 = dma.done.wait [#allocation10], 256  }
  0x49   :  { %257 = vsyncadd [#allocation10], 4294967040  ;;  %s76_s18 = ssub.f32 0.0, %s384_s0  ;;  %v77_v1 = vld [vmem:[#allocation8] sm:$0xf]  ;;  %v108_v8 = vlaneseq  ;;  %s266_s0 = smov [#allocation11]  }
  0x4a   :  { %v81_v2 = vld [vmem:[#allocation3] sm:$0xf]  ;;  %v84_v3 = vld [vmem:[#allocation6] sm:$0xf]  ;;  %v78_v6 = vld [vmem:[#allocation8 + $0x4] sm:$0xf] }
  0x4b   :  { %v82_v0 = vstv %s76_s18  ;;  %v88_v5 = vsub.f32 %v77_v1, %v84_v3  ;;  %v85_v7 = vld [vmem:[#allocation6 + $0x4] sm:$0xf]  ;;  %v79_v10 = vld [vmem:[#allocation8 + $0x8] sm:$0xf]  ;;  %v86_v11 = vld [vmem:[#allocation6 + $0x8] sm:$0xf] }
  0x4c   :  { %v83_v4 = vmul.f32 %v82_v0, %v81_v2  ;;  %v89_v9 = vsub.f32 %v78_v6, %v85_v7  ;;  %v90_v13 = vsub.f32 %v79_v10, %v86_v11  ;;  %v80_v14 = vld [vmem:[#allocation8 + $0xc] sm:$0xf]  ;;  %v87_v15 = vld [vmem:[#allocation6 + $0xc] sm:$0xf]  ;;  %v100_v16 = vld [vmem:[#allocation9] sm:$0xf] }
  0x4d   :  { %v91_v18 = vsub.f32 %v80_v14, %v87_v15  ;;  %v101_v20 = vld [vmem:[#allocation9 + $0x4] sm:$0xf]  ;;  %vm357_vm0 = vcmp.lt.s32.totalorder %v108_v8, 512  ;;  %v102_v24 = vld [vmem:[#allocation9 + $0x8] sm:$0xf]  ;;  %s121_s4 = sshll.u32 %s266_s0, 4  ;;  %s122_s4 = int_to_ptr.vmem [resolvable:$true] %s121_s4 }
  0x4e   :  { %v92_v12 = vmul.f32 %v88_v5, %v83_v4  ;;  %v93_v17 = vmul.f32 %v89_v9, %v83_v4  ;;  %v94_v21 = vmul.f32 %v90_v13, %v83_v4  ;;  %v103_v28 = vld [vmem:[#allocation9 + $0xc] sm:$0xf]  ;;  %s230_s19 = scalar_lea.vmem %s122_s4, 256  ;;  %p235_p5 = scmp.lt.s32.totalorder %s122_s4, %s122_s4 }
  0x4f   :  { %v95_v25 = vmul.f32 %v91_v18, %v83_v4  ;;  %p231_p4 = scmp.ne.s32.totalorder %s122_s4, %s230_s19  ;;  %p236_p6 = scmp.lt.s32.totalorder %s230_s19, %s230_s19 }
  0x50   :  { %v96_v19 = vadd.f32 %v92_v12, %v77_v1  ;;  %v97_v23 = vadd.f32 %v93_v17, %v78_v6  ;;  %v98_v27 = vadd.f32 %v94_v21, %v79_v10 }
  0x51   :  { %v99_v30 = vadd.f32 %v95_v25, %v80_v14  ;;  %p237_p7 = por %p236_p6, %p235_p5 }
  0x52   :  { %v104_v26 = vsub.f32 %v96_v19, %v100_v16  ;;  %v105_v29 = vsub.f32 %v97_v23, %v101_v20  ;;  %v106_v31 = vsub.f32 %v98_v27, %v102_v24 }
  0x53   :  { %v107_v32 = vsub.f32 %v99_v30, %v103_v28  ;;  %p238_p8 = pnand %p237_p7, %p231_p4 }
  0x54   :  { %112 = vst.msk [vmem:[#allocation11] sm:$0xf] %vm357_vm0, %v104_v26  ;;  %113 = vst.msk [vmem:[#allocation11 + $0x4] sm:$0xf] %vm357_vm0, %v105_v29 }
  0x55   :  { %114 = vst.msk [vmem:[#allocation11 + $0x8] sm:$0xf] %vm357_vm0, %v106_v31  ;;  %115 = vst.msk [vmem:[#allocation11 + $0xc] sm:$0xf] %vm357_vm0, %v107_v32 }
  0x56   :  { %241 = shalt.err (!%p238_p8)
}
  0x57   :  { %s242_s22 = scalar_lea.hbm %s389_s5, 256 }
  0x58   :  { %p243_p9 = scmp.ne.s32.totalorder %s389_s5, %s242_s22  ;;  %p246_p10 = scmp.lt.u32.totalorder %s242_s22, %s389_s5 }
  0x5a   :  { %p248_p11 = pnand %p246_p10, %p243_p9 }
  0x5c   :  { %251 = shalt.err (!%p248_p11)
}
  0x5d   :  { %127 = dma.vmem_to_hbm [thread:$0]  %s122_s4, 256, %s389_s5, [#allocation5], %s261_s28, %s261_s28, %s262_s29  }
  0x5e   :  { %258 = dma.done.wait [#allocation5], 256  }
  0x5f   :  { %259 = vsyncadd [#allocation5], 4294967040 }
  0x60   :  { %131 = vsyncpa [#allocation4], 1 }
  0x61   :  { %132 = vsyncpa [#allocation7], 1 }
  0x62   :  { %133 = vsyncpa [#allocation10], 1 }
  0x63   :  { %134 = vsyncpa [#allocation5], 1 }

</bundles_post_ra>
